<compile_context>
chip_gen: v7x
topology: tpu7x:2x2x1
jax: 0.10.0
libtpu: 0.0.40
codegen_flags: <defaults>
</compile_context>

<pallas_src>
import jax
import jax.numpy as jnp
from jax.experimental import pallas as pl
from jax.experimental.pallas import tpu as pltpu

LANE = 128
SUBLANE = 8


def rnn_kernel(x_ref, wih_ref, whh_ref, b_ref, wfc_ref, bfc_ref, out_ref, xp_ref):
    # Shapes (all padded to lane/sublane-dense sizes):
    #   x_ref  : (T*Bp, Ip)   time-major flattened input
    #   wih_ref: (Ip, Hp)     W_ih^T
    #   whh_ref: (Hp, Hp)     W_hh^T
    #   b_ref  : (1, Hp)      b_ih + b_hh (pre-summed)
    #   wfc_ref: (Hp, Op)     W_fc^T
    #   bfc_ref: (1, Op)
    #   out_ref: (Bp, Op)
    #   xp_ref : (T*Bp, Hp)   scratch: hoisted input projection
    Bp = out_ref.shape[0]
    T = x_ref.shape[0] // Bp
    Hp = whh_ref.shape[0]

    # Hoisted, non-recurrent pass: one big MXU matmul for all timesteps.
    xp_ref[...] = (
        jnp.dot(x_ref[...], wih_ref[...], preferred_element_type=jnp.float32)
        + b_ref[...]
    )

    # Keep W_hh^T resident across the unrolled recurrence.
    whh = whh_ref[...]

    def step(t, h):
        row = pl.multiple_of(t * Bp, Bp)
        x_t = xp_ref[pl.ds(row, Bp), :]  # (Bp, Hp) contiguous leading-axis slice
        pre = x_t + jnp.dot(h, whh, preferred_element_type=jnp.float32)
        return jnp.tanh(pre)  # tanh -> EUP slot, overlaps next step's MXU push

    h0 = jnp.zeros((Bp, Hp), jnp.float32)  # PyTorch forward uses h0 = zeros
    h = jax.lax.fori_loop(0, T, step, h0, unroll=True)

    logits = jnp.dot(h, wfc_ref[...], preferred_element_type=jnp.float32) + bfc_ref[...]
    out_ref[...] = jax.nn.sigmoid(logits).astype(out_ref.dtype)


def rnn_forward(x, w_ih, w_hh, b_ih, b_hh, w_fc, b_fc):
    """x: (B, T, I) batch-first float32.  Returns (B, O) sigmoid outputs."""
    B, T, I = x.shape
    H = w_hh.shape[0]
    O = w_fc.shape[0]

    # Lane-dense / sublane-dense padded sizes (zero padding keeps math exact).
    Ip = pl.cdiv(I, LANE) * LANE
    Hp = pl.cdiv(H, LANE) * LANE
    Op = pl.cdiv(O, LANE) * LANE
    Bp = pl.cdiv(B, SUBLANE) * SUBLANE

    # Time-major flatten so each timestep is a contiguous leading-axis block
    # inside the kernel; pad batch to Bp sublanes and features to Ip lanes.
    x_tm = jnp.transpose(x, (1, 0, 2)).astype(jnp.float32)          # (T, B, I)
    x_p = (
        jnp.zeros((T, Bp, Ip), jnp.float32)
        .at[:, :B, :I]
        .set(x_tm)
        .reshape(T * Bp, Ip)
    )

    wih_p = jnp.zeros((Ip, Hp), jnp.float32).at[:I, :H].set(w_ih.T)
    whh_p = jnp.zeros((Hp, Hp), jnp.float32).at[:H, :H].set(w_hh.T)
    wfc_p = jnp.zeros((Hp, Op), jnp.float32).at[:H, :O].set(w_fc.T)
    b_p = jnp.zeros((1, Hp), jnp.float32).at[0, :H].set(b_ih + b_hh)  # pre-summed bias
    bfc_p = jnp.zeros((1, Op), jnp.float32).at[0, :O].set(b_fc)

    out_p = pl.pallas_call(
        rnn_kernel,
        out_shape=jax.ShapeDtypeStruct((Bp, Op), jnp.float32),
        # No grid: weights loaded once, no per-step pipeline overhead.
        scratch_shapes=[pltpu.VMEM((T * Bp, Hp), jnp.float32)],
        compiler_params=pltpu.CompilerParams(vmem_limit_bytes=64 << 20),
    )(x_p, wih_p, whh_p, b_p, wfc_p, bfc_p)

    return out_p[:B, :O]


def rnn_reference(x, w_ih, w_hh, b_ih, b_hh, w_fc, b_fc):
    B, T, I = x.shape
    H = w_hh.shape[0]
    h = jnp.zeros((B, H), jnp.float32)
    for t in range(T):
        h = jnp.tanh(x[:, t, :] @ w_ih.T + b_ih + h @ w_hh.T + b_hh)
    return jax.nn.sigmoid(h @ w_fc.T + b_fc)


if __name__ == "__main__":
    B, T, I, H, O = 8, 8, 16, 32, 4  # batch, seq, input_size, hidden_size, output_size

    key = jax.random.PRNGKey(0)
    ks = jax.random.split(key, 7)
    scale = 1.0 / jnp.sqrt(H)
    x = jax.random.normal(ks[0], (B, T, I), jnp.float32)
    w_ih = jax.random.uniform(ks[1], (H, I), jnp.float32, -scale, scale)
    w_hh = jax.random.uniform(ks[2], (H, H), jnp.float32, -scale, scale)
    b_ih = jax.random.uniform(ks[3], (H,), jnp.float32, -scale, scale)
    b_hh = jax.random.uniform(ks[4], (H,), jnp.float32, -scale, scale)
    w_fc = jax.random.uniform(ks[5], (O, H), jnp.float32, -scale, scale)
    b_fc = jax.random.uniform(ks[6], (O,), jnp.float32, -scale, scale)

    out = rnn_forward(x, w_ih, w_hh, b_ih, b_hh, w_fc, b_fc)
    out = jax.block_until_ready(out)

    ref = rnn_reference(x, w_ih, w_hh, b_ih, b_hh, w_fc, b_fc)
    assert out.shape == (B, O)
    assert jnp.allclose(out, ref, atol=1e-5, rtol=1e-5)

    print("KERNEL_OK")
</pallas_src>

<mosaic_0001>
module attributes {stable_mosaic.version = 11 : i64} {
  func.func @rnn_kernel(%arg0: memref<64x128xf32, #tpu.memory_space<vmem>>, %arg1: memref<128x128xf32, #tpu.memory_space<vmem>>, %arg2: memref<128x128xf32, #tpu.memory_space<vmem>>, %arg3: memref<1x128xf32, #tpu.memory_space<vmem>>, %arg4: memref<128x128xf32, #tpu.memory_space<vmem>>, %arg5: memref<1x128xf32, #tpu.memory_space<vmem>>, %arg6: memref<8x128xf32, #tpu.memory_space<vmem>>, %arg7: memref<64x128xf32, #tpu.memory_space<vmem>>) attributes {dimension_semantics = [], scalar_prefetch = 0 : i64, scratch_operands = 1 : i64, tpu.core_type = #tpu.core_type<tc>} {
    %c0 = arith.constant 0 : index
    %c0_0 = arith.constant 0 : index
    %0 = vector.load %arg0[%c0, %c0_0] : memref<64x128xf32, #tpu.memory_space<vmem>>, vector<64x128xf32>
    %c0_1 = arith.constant 0 : index
    %c0_2 = arith.constant 0 : index
    %1 = vector.load %arg1[%c0_1, %c0_2] : memref<128x128xf32, #tpu.memory_space<vmem>>, vector<128x128xf32>
    %cst = arith.constant dense<0.000000e+00> : vector<64x128xf32>
    %2 = tpu.matmul %0, %1, %cst {dimension_numbers = #tpu.dot_dimension_numbers<[1], [0], [0], [1], [0, 0, 1, 1], [], []>} : vector<64x128xf32>, vector<128x128xf32>, vector<64x128xf32> -> vector<64x128xf32>
    %c0_3 = arith.constant 0 : index
    %c0_4 = arith.constant 0 : index
    %3 = vector.load %arg3[%c0_3, %c0_4] : memref<1x128xf32, #tpu.memory_space<vmem>>, vector<1x128xf32>
    %4 = vector.broadcast %3 : vector<1x128xf32> to vector<64x128xf32>
    %5 = arith.addf %2, %4 : vector<64x128xf32>
    %c0_5 = arith.constant 0 : index
    %c0_6 = arith.constant 0 : index
    %6 = vector.load %arg7[%c0_5, %c0_6] : memref<64x128xf32, #tpu.memory_space<vmem>>, vector<64x128xf32>
    tpu.vector_store %arg7[%c0_5, %c0_6], %5 {strides = array<i32>} : memref<64x128xf32, #tpu.memory_space<vmem>>, vector<64x128xf32>,
    %c0_7 = arith.constant 0 : index
    %c0_8 = arith.constant 0 : index
    %7 = vector.load %arg2[%c0_7, %c0_8] : memref<128x128xf32, #tpu.memory_space<vmem>>, vector<128x128xf32>
    %cst_9 = arith.constant 0.000000e+00 : f32
    %8 = vector.broadcast %cst_9 : f32 to vector<8x128xf32>
    %c0_i32 = arith.constant 0 : i32
    %c8_i32 = arith.constant 8 : i32
    %9 = arith.muli %c0_i32, %c8_i32 : i32
    %10 = tpu.assume_multiple %9, 8 : i32
    %11 = arith.index_cast %10 : i32 to index
    %c0_10 = arith.constant 0 : index
    %12 = vector.load %arg7[%11, %c0_10] : memref<64x128xf32, #tpu.memory_space<vmem>>, vector<8x128xf32>
    %cst_11 = arith.constant dense<0.000000e+00> : vector<8x128xf32>
    %13 = tpu.matmul %8, %7, %cst_11 {dimension_numbers = #tpu.dot_dimension_numbers<[1], [0], [0], [1], [0, 0, 1, 1], [], []>} : vector<8x128xf32>, vector<128x128xf32>, vector<8x128xf32> -> vector<8x128xf32>
    %14 = arith.addf %12, %13 : vector<8x128xf32>
    %15 = math.tanh %14 : vector<8x128xf32>
    %c1_i32 = arith.constant 1 : i32
    %c8_i32_12 = arith.constant 8 : i32
    %16 = arith.muli %c1_i32, %c8_i32_12 : i32
    %17 = tpu.assume_multiple %16, 8 : i32
    %18 = arith.index_cast %17 : i32 to index
    %c0_13 = arith.constant 0 : index
    %19 = vector.load %arg7[%18, %c0_13] : memref<64x128xf32, #tpu.memory_space<vmem>>, vector<8x128xf32>
    %cst_14 = arith.constant dense<0.000000e+00> : vector<8x128xf32>
    %20 = tpu.matmul %15, %7, %cst_14 {dimension_numbers = #tpu.dot_dimension_numbers<[1], [0], [0], [1], [0, 0, 1, 1], [], []>} : vector<8x128xf32>, vector<128x128xf32>, vector<8x128xf32> -> vector<8x128xf32>
    %21 = arith.addf %19, %20 : vector<8x128xf32>
    %22 = math.tanh %21 : vector<8x128xf32>
    %c2_i32 = arith.constant 2 : i32
    %c8_i32_15 = arith.constant 8 : i32
    %23 = arith.muli %c2_i32, %c8_i32_15 : i32
    %24 = tpu.assume_multiple %23, 8 : i32
    %25 = arith.index_cast %24 : i32 to index
    %c0_16 = arith.constant 0 : index
    %26 = vector.load %arg7[%25, %c0_16] : memref<64x128xf32, #tpu.memory_space<vmem>>, vector<8x128xf32>
    %cst_17 = arith.constant dense<0.000000e+00> : vector<8x128xf32>
    %27 = tpu.matmul %22, %7, %cst_17 {dimension_numbers = #tpu.dot_dimension_numbers<[1], [0], [0], [1], [0, 0, 1, 1], [], []>} : vector<8x128xf32>, vector<128x128xf32>, vector<8x128xf32> -> vector<8x128xf32>
    %28 = arith.addf %26, %27 : vector<8x128xf32>
    %29 = math.tanh %28 : vector<8x128xf32>
    %c3_i32 = arith.constant 3 : i32
    %c8_i32_18 = arith.constant 8 : i32
    %30 = arith.muli %c3_i32, %c8_i32_18 : i32
    %31 = tpu.assume_multiple %30, 8 : i32
    %32 = arith.index_cast %31 : i32 to index
    %c0_19 = arith.constant 0 : index
    %33 = vector.load %arg7[%32, %c0_19] : memref<64x128xf32, #tpu.memory_space<vmem>>, vector<8x128xf32>
    %cst_20 = arith.constant dense<0.000000e+00> : vector<8x128xf32>
    %34 = tpu.matmul %29, %7, %cst_20 {dimension_numbers = #tpu.dot_dimension_numbers<[1], [0], [0], [1], [0, 0, 1, 1], [], []>} : vector<8x128xf32>, vector<128x128xf32>, vector<8x128xf32> -> vector<8x128xf32>
    %35 = arith.addf %33, %34 : vector<8x128xf32>
    %36 = math.tanh %35 : vector<8x128xf32>
    %c4_i32 = arith.constant 4 : i32
    %c8_i32_21 = arith.constant 8 : i32
    %37 = arith.muli %c4_i32, %c8_i32_21 : i32
    %38 = tpu.assume_multiple %37, 8 : i32
    %39 = arith.index_cast %38 : i32 to index
    %c0_22 = arith.constant 0 : index
    %40 = vector.load %arg7[%39, %c0_22] : memref<64x128xf32, #tpu.memory_space<vmem>>, vector<8x128xf32>
    %cst_23 = arith.constant dense<0.000000e+00> : vector<8x128xf32>
    %41 = tpu.matmul %36, %7, %cst_23 {dimension_numbers = #tpu.dot_dimension_numbers<[1], [0], [0], [1], [0, 0, 1, 1], [], []>} : vector<8x128xf32>, vector<128x128xf32>, vector<8x128xf32> -> vector<8x128xf32>
    %42 = arith.addf %40, %41 : vector<8x128xf32>
    %43 = math.tanh %42 : vector<8x128xf32>
    %c5_i32 = arith.constant 5 : i32
    %c8_i32_24 = arith.constant 8 : i32
    %44 = arith.muli %c5_i32, %c8_i32_24 : i32
    %45 = tpu.assume_multiple %44, 8 : i32
    %46 = arith.index_cast %45 : i32 to index
    %c0_25 = arith.constant 0 : index
    %47 = vector.load %arg7[%46, %c0_25] : memref<64x128xf32, #tpu.memory_space<vmem>>, vector<8x128xf32>
    %cst_26 = arith.constant dense<0.000000e+00> : vector<8x128xf32>
    %48 = tpu.matmul %43, %7, %cst_26 {dimension_numbers = #tpu.dot_dimension_numbers<[1], [0], [0], [1], [0, 0, 1, 1], [], []>} : vector<8x128xf32>, vector<128x128xf32>, vector<8x128xf32> -> vector<8x128xf32>
    %49 = arith.addf %47, %48 : vector<8x128xf32>
    %50 = math.tanh %49 : vector<8x128xf32>
    %c6_i32 = arith.constant 6 : i32
    %c8_i32_27 = arith.constant 8 : i32
    %51 = arith.muli %c6_i32, %c8_i32_27 : i32
    %52 = tpu.assume_multiple %51, 8 : i32
    %53 = arith.index_cast %52 : i32 to index
    %c0_28 = arith.constant 0 : index
    %54 = vector.load %arg7[%53, %c0_28] : memref<64x128xf32, #tpu.memory_space<vmem>>, vector<8x128xf32>
    %cst_29 = arith.constant dense<0.000000e+00> : vector<8x128xf32>
    %55 = tpu.matmul %50, %7, %cst_29 {dimension_numbers = #tpu.dot_dimension_numbers<[1], [0], [0], [1], [0, 0, 1, 1], [], []>} : vector<8x128xf32>, vector<128x128xf32>, vector<8x128xf32> -> vector<8x128xf32>
    %56 = arith.addf %54, %55 : vector<8x128xf32>
    %57 = math.tanh %56 : vector<8x128xf32>
    %c7_i32 = arith.constant 7 : i32
    %c8_i32_30 = arith.constant 8 : i32
    %58 = arith.muli %c7_i32, %c8_i32_30 : i32
    %59 = tpu.assume_multiple %58, 8 : i32
    %60 = arith.index_cast %59 : i32 to index
    %c0_31 = arith.constant 0 : index
    %61 = vector.load %arg7[%60, %c0_31] : memref<64x128xf32, #tpu.memory_space<vmem>>, vector<8x128xf32>
    %cst_32 = arith.constant dense<0.000000e+00> : vector<8x128xf32>
    %62 = tpu.matmul %57, %7, %cst_32 {dimension_numbers = #tpu.dot_dimension_numbers<[1], [0], [0], [1], [0, 0, 1, 1], [], []>} : vector<8x128xf32>, vector<128x128xf32>, vector<8x128xf32> -> vector<8x128xf32>
    %63 = arith.addf %61, %62 : vector<8x128xf32>
    %64 = math.tanh %63 : vector<8x128xf32>
    %c8_i32_33 = arith.constant 8 : i32
    %c0_34 = arith.constant 0 : index
    %c0_35 = arith.constant 0 : index
    %65 = vector.load %arg4[%c0_34, %c0_35] : memref<128x128xf32, #tpu.memory_space<vmem>>, vector<128x128xf32>
    %cst_36 = arith.constant dense<0.000000e+00> : vector<8x128xf32>
    %66 = tpu.matmul %64, %65, %cst_36 {dimension_numbers = #tpu.dot_dimension_numbers<[1], [0], [0], [1], [0, 0, 1, 1], [], []>} : vector<8x128xf32>, vector<128x128xf32>, vector<8x128xf32> -> vector<8x128xf32>
    %c0_37 = arith.constant 0 : index
    %c0_38 = arith.constant 0 : index
    %67 = vector.load %arg5[%c0_37, %c0_38] : memref<1x128xf32, #tpu.memory_space<vmem>>, vector<1x128xf32>
    %68 = vector.broadcast %67 : vector<1x128xf32> to vector<8x128xf32>
    %69 = arith.addf %66, %68 : vector<8x128xf32>
    %70 = arith.negf %69 : vector<8x128xf32>
    %71 = math.exp %70 : vector<8x128xf32>
    %cst_39 = arith.constant 1.000000e+00 : f32
    %72 = vector.broadcast %cst_39 : f32 to vector<8x128xf32>
    %73 = arith.addf %72, %71 : vector<8x128xf32>
    %74 = arith.divf %72, %73 : vector<8x128xf32>
    %c0_40 = arith.constant 0 : index
    %c0_41 = arith.constant 0 : index
    %75 = vector.load %arg6[%c0_40, %c0_41] : memref<8x128xf32, #tpu.memory_space<vmem>>, vector<8x128xf32>
    tpu.vector_store %arg6[%c0_40, %c0_41], %74 {strides = array<i32>} : memref<8x128xf32, #tpu.memory_space<vmem>>, vector<8x128xf32>,
    return
  }
}

</mosaic_0001>

<bundles_post_ra>
// kernel: tpu_custom_call.1
= control target key start
LH: loop header
LB: loop body
LE: loop exit
PB: predicated region body
PF: predicated region fallthrough
CT: control target
= control target key end

     0   :  { %11 = vsyncpa [#allocation4], 0  ;;  %s2305_s0 = inlined_call_operand.hbm [shape: f32[64,128], index: 0, kind: input, shape index: {}]   ;;  %s2306_s1 = inlined_call_operand.hbm [shape: f32[128,128], index: 1, kind: input, shape index: {}]   ;;  %s2307_s2 = inlined_call_operand.hbm [shape: f32[128,128], index: 2, kind: input, shape index: {}]   ;;  %s2308_s3 = inlined_call_operand.hbm [shape: f32[1,128], index: 3, kind: input, shape index: {}]   ;;  %s2309_s4 = inlined_call_operand.hbm [shape: f32[128,128], index: 4, kind: input, shape index: {}]   ;;  %s2310_s5 = inlined_call_operand.hbm [shape: f32[1,128], index: 5, kind: input, shape index: {}]   ;;  %s2311_s6 = inlined_call_operand.hbm [shape: f32[8,128], index: 6, kind: output, shape index: {}]  }
   0x1   :  { %12 = vsyncpa [#allocation7], 0 }
   0x2   :  { %13 = vsyncpa [#allocation10], 0 }
   0x3   :  { %14 = vsyncpa [#allocation13], 0 }
   0x4   :  { %15 = vsyncpa [#allocation5], 0  ;;  %s1954_s21 = smov [#allocation6]   ;;  %s1955_s23 = smov [#allocation9]  }
   0x5   :  { %s33_s22 = sshll.u32 %s1954_s21, 4  ;;  %s58_s24 = sshll.u32 %s1955_s23, 4  ;;  %s34_s22 = int_to_ptr.vmem [resolvable:$true] %s33_s22  ;;  %s2001_s24 = int_to_ptr.vmem [resolvable:$true] %s58_s24 }
   0x6   :  { %s1790_s27 = scalar_lea.hbm %s2306_s1, 2048 }
   0x7   :  { %p1791_p0 = scmp.ne.s32.totalorder %s2306_s1, %s1790_s27  ;;  %p1794_p1 = scmp.lt.u32.totalorder %s1790_s27, %s2306_s1 }
   0x9   :  { %p1796_p2 = pnand %p1794_p1, %p1791_p0 }
   0xb   :  { %1799 = shalt.err (!%p1796_p2)
}
   0xc   :  { %s1800_s8 = scalar_lea.vmem %s34_s22, 2048  ;;  %p1805_p4 = scmp.lt.s32.totalorder %s34_s22, %s34_s22 }
   0xd   :  { %p1801_p3 = scmp.ne.s32.totalorder %s34_s22, %s1800_s8  ;;  %p1806_p5 = scmp.lt.s32.totalorder %s1800_s8, %s1800_s8 }
   0xf   :  { %p1807_p6 = por %p1806_p5, %p1805_p4 }
  0x11   :  { %p1808_p7 = pnand %p1807_p6, %p1801_p3 }
  0x13   :  { %1811 = shalt.err (!%p1808_p7)
}
  0x14   :  { %s1956_s9 = smov 128   ;;  %s1957_s10 = smov 8  }
  0x15   :  { %39 = dma.hbm_to_vmem [thread:$0]  %s2306_s1, 2048, %s34_s22, [#allocation7], %s1956_s9, %s1956_s9, %s1957_s10  }
  0x16   :  { %s1812_s15 = scalar_lea.hbm %s2308_s3, 16 }
  0x17   :  { %p1813_p8 = scmp.ne.s32.totalorder %s2308_s3, %s1812_s15  ;;  %p1816_p9 = scmp.lt.u32.totalorder %s1812_s15, %s2308_s3 }
  0x19   :  { %p1818_p10 = pnand %p1816_p9, %p1813_p8 }
  0x1b   :  { %1821 = shalt.err (!%p1818_p10)
}
  0x1c   :  { %s1822_s20 = scalar_lea.vmem %s2001_s24, 16  ;;  %s1826_s1 = scalar_lea.vmem %s2001_s24, 32 }
  0x1d   :  { %p1823_p11 = scmp.ne.s32.totalorder %s2001_s24, %s1822_s20  ;;  %p1827_p12 = scmp.lt.s32.totalorder %s2001_s24, %s2001_s24 }
  0x1e   :  { %p1828_p13 = scmp.lt.s32.totalorder %s1826_s1, %s1822_s20 }
  0x20   :  { %p1829_p0 = por %p1828_p13, %p1827_p12 }
  0x22   :  { %p1830_p1 = pnand %p1829_p0, %p1823_p11 }
  0x24   :  { %1833 = shalt.err (!%p1830_p1)
}
  0x25   :  { %61 = dma.hbm_to_vmem [thread:$0]  %s2308_s3, 16, %s2001_s24, [#allocation10]  }
  0x26   :  { %s1958_s23 = smov [#allocation3]   ;;  %s1959_s26 = smov [#allocation8]  }
  0x27   :  { %s21_s25 = sshll.u32 %s1958_s23, 4  ;;  %s45_s27 = sshll.u32 %s1959_s26, 4  ;;  %s22_s25 = int_to_ptr.vmem [resolvable:$true] %s21_s25  ;;  %s2036_s27 = int_to_ptr.vmem [resolvable:$true] %s45_s27 }
  0x28   :  { %s1834_s30 = scalar_lea.hbm %s2305_s0, 1024 }
  0x29   :  { %p1835_p2 = scmp.ne.s32.totalorder %s2305_s0, %s1834_s30  ;;  %p1838_p3 = scmp.lt.u32.totalorder %s1834_s30, %s2305_s0 }
  0x2b   :  { %p1840_p4 = pnand %p1838_p3, %p1835_p2 }
  0x2d   :  { %1843 = shalt.err (!%p1840_p4)
}
  0x2e   :  { %s1844_s3 = scalar_lea.vmem %s22_s25, 1024  ;;  %p1849_p6 = scmp.lt.s32.totalorder %s22_s25, %s22_s25 }
  0x2f   :  { %p1845_p5 = scmp.ne.s32.totalorder %s22_s25, %s1844_s3  ;;  %p1850_p7 = scmp.lt.s32.totalorder %s1844_s3, %s1844_s3 }
  0x31   :  { %p1851_p8 = por %p1850_p7, %p1849_p6 }
  0x33   :  { %p1852_p9 = pnand %p1851_p8, %p1845_p5 }
  0x35   :  { %1855 = shalt.err (!%p1852_p9)
}
  0x36   :  { %27 = dma.hbm_to_vmem [thread:$0]  %s2305_s0, 1024, %s22_s25, [#allocation4], %s1956_s9, %s1956_s9, %s1957_s10  }
  0x37   :  { %s1856_s16 = scalar_lea.hbm %s2307_s2, 2048 }
  0x38   :  { %p1857_p10 = scmp.ne.s32.totalorder %s2307_s2, %s1856_s16  ;;  %p1860_p11 = scmp.lt.u32.totalorder %s1856_s16, %s2307_s2 }
  0x3a   :  { %p1862_p12 = pnand %p1860_p11, %p1857_p10 }
  0x3c   :  { %1865 = shalt.err (!%p1862_p12)
}
  0x3d   :  { %s1866_s1 = scalar_lea.vmem %s2036_s27, 2048  ;;  %p1871_p0 = scmp.lt.s32.totalorder %s2036_s27, %s2036_s27 }
  0x3e   :  { %p1867_p13 = scmp.ne.s32.totalorder %s2036_s27, %s1866_s1  ;;  %p1872_p1 = scmp.lt.s32.totalorder %s1866_s1, %s1866_s1 }
  0x40   :  { %p1873_p2 = por %p1872_p1, %p1871_p0 }
  0x42   :  { %p1874_p3 = pnand %p1873_p2, %p1867_p13 }
  0x44   :  { %1877 = shalt.err (!%p1874_p3)
}
  0x45   :  { %51 = dma.hbm_to_vmem [thread:$0]  %s2307_s2, 2048, %s2036_s27, [#allocation7], %s1956_s9, %s1956_s9, %s1957_s10  }
  0x46   :  { %s1960_s22 = smov [#allocation11]   ;;  %s1961_s25 = smov [#allocation12]  }
  0x47   :  { %s67_s23 = sshll.u32 %s1960_s22, 4  ;;  %s80_s26 = sshll.u32 %s1961_s25, 4  ;;  %s68_s23 = int_to_ptr.vmem [resolvable:$true] %s67_s23  ;;  %s81_s26 = int_to_ptr.vmem [resolvable:$true] %s80_s26 }
  0x48   :  { %s1878_s30 = scalar_lea.hbm %s2309_s4, 2048 }
  0x49   :  { %p1879_p4 = scmp.ne.s32.totalorder %s2309_s4, %s1878_s30  ;;  %p1882_p5 = scmp.lt.u32.totalorder %s1878_s30, %s2309_s4 }
  0x4b   :  { %p1884_p6 = pnand %p1882_p5, %p1879_p4 }
  0x4d   :  { %1887 = shalt.err (!%p1884_p6)
}
  0x4e   :  { %s1888_s2 = scalar_lea.vmem %s68_s23, 2048  ;;  %p1893_p8 = scmp.lt.s32.totalorder %s68_s23, %s68_s23 }
  0x4f   :  { %p1889_p7 = scmp.ne.s32.totalorder %s68_s23, %s1888_s2  ;;  %p1894_p9 = scmp.lt.s32.totalorder %s1888_s2, %s1888_s2 }
  0x51   :  { %p1895_p10 = por %p1894_p9, %p1893_p8 }
  0x53   :  { %p1896_p11 = pnand %p1895_p10, %p1889_p7 }
  0x55   :  { %1899 = shalt.err (!%p1896_p11)
}
  0x56   :  { %73 = dma.hbm_to_vmem [thread:$0]  %s2309_s4, 2048, %s68_s23, [#allocation10], %s1956_s9, %s1956_s9, %s1957_s10  }
  0x57   :  { %s1900_s14 = scalar_lea.hbm %s2310_s5, 16 }
  0x58   :  { %p1901_p12 = scmp.ne.s32.totalorder %s2310_s5, %s1900_s14  ;;  %p1904_p13 = scmp.lt.u32.totalorder %s1900_s14, %s2310_s5 }
  0x5a   :  { %p1906_p0 = pnand %p1904_p13, %p1901_p12 }
  0x5c   :  { %1909 = shalt.err (!%p1906_p0)
}
  0x5d   :  { %s1910_s19 = scalar_lea.vmem %s81_s26, 16  ;;  %s1914_s20 = scalar_lea.vmem %s81_s26, 32 }
  0x5e   :  { %p1911_p1 = scmp.ne.s32.totalorder %s81_s26, %s1910_s19  ;;  %p1915_p2 = scmp.lt.s32.totalorder %s81_s26, %s81_s26 }
  0x5f   :  { %p1916_p3 = scmp.lt.s32.totalorder %s1914_s20, %s1910_s19 }
  0x61   :  { %p1917_p4 = por %p1916_p3, %p1915_p2 }
  0x63   :  { %p1918_p5 = pnand %p1917_p4, %p1911_p1 }
  0x65   :  { %1921 = shalt.err (!%p1918_p5)
}
  0x66   :  { %83 = dma.hbm_to_vmem [thread:$0]  %s2310_s5, 16, %s81_s26, [#allocation13]  }
  0x67   :  { %1944 = dma.done.wait [#allocation4], 1024  }
  0x68   :  { %1945 = vsyncadd [#allocation4], 4294966272 }
  0x69   :  { %1946 = dma.done.wait [#allocation7], 4096  }
  0x6a   :  { %1947 = vsyncadd [#allocation7], 4294963200 }
  0x6b   :  { %1948 = dma.done.wait [#allocation10], 2064  }
  0x6c   :  { %1949 = vsyncadd [#allocation10], 4294965232 }
  0x6d   :  { %1950 = dma.done.wait [#allocation13], 16  }
  0x6e   :  { %1951 = vsyncadd [#allocation13], 4294967280  ;;  %v1962_v0 = vmov 0.0|0.0   ;;  %vm1963_vm0 = vmmov 0   ;;  %v1964_v1 = vmov 0.0   ;;  %v110_v2 = vld [vmem:[#allocation6] sm:$0xff] }
  0x6f   :  { %1542 = vmatprep.subr.bf16.mxu1 %v1962_v0  ;;  %1227 = vmatprep.mubr.msk.f32.mxu1 %vm1963_vm0, %v1964_v1  ;;  %v111_v3 = vld [vmem:[#allocation6 + $0x8] sm:$0xff]  ;;  %v246_v4 = vld [vmem:[#allocation8] sm:$0xff]  ;;  %v112_v7 = vld [vmem:[#allocation6 + $0x10] sm:$0xff]  ;;  %s1965_s5 = smov [#allocation14]  }
  0x70   :  { %v1510_v5 = vpack.c.bf16 %v111_v3, %v110_v2  ;;  %v247_v6 = vld [vmem:[#allocation8 + $0x8] sm:$0xff]  ;;  %v113_v8 = vld [vmem:[#allocation6 + $0x18] sm:$0xff]  ;;  %v248_v11 = vld [vmem:[#allocation8 + $0x10] sm:$0xff]  ;;  %s959_s10 = sshll.u32 %s1965_s5, 4  ;;  %s960_s10 = int_to_ptr.vmem [resolvable:$true] %s959_s10 }
  0x71   :  { %v2103_v9 = vpack.c.bf16 %v247_v6, %v246_v4  ;;  %v1514_v10 = vpack.c.bf16 %v113_v8, %v112_v7  ;;  %v249_v12 = vld [vmem:[#allocation8 + $0x18] sm:$0xff]  ;;  %v114_v13 = vld [vmem:[#allocation6 + $0x20] sm:$0xff]  ;;  %v115_v14 = vld [vmem:[#allocation6 + $0x28] sm:$0xff]  ;;  %s1922_s1 = scalar_lea.vmem %s960_s10, 128  ;;  %p1927_p7 = scmp.lt.s32.totalorder %s960_s10, %s960_s10 }
  0x72   :  { %1511 = vmatprep.subr.bf16.mxu0 %v1510_v5  ;;  %v2106_v15 = vpack.c.bf16 %v249_v12, %v248_v11  ;;  %v1518_v16 = vpack.c.bf16 %v115_v14, %v114_v13  ;;  %v250_v17 = vld [vmem:[#allocation8 + $0x20] sm:$0xff]  ;;  %v251_v18 = vld [vmem:[#allocation8 + $0x28] sm:$0xff]  ;;  %v116_v19 = vld [vmem:[#allocation6 + $0x30] sm:$0xff]  ;;  %p1923_p6 = scmp.ne.s32.totalorder %s960_s10, %s1922_s1  ;;  %p1928_p8 = scmp.lt.s32.totalorder %s1922_s1, %s1922_s1 }
  0x73   :  { %1513 = vmatpush3.bf16.msra.mxu0 %v1510_v5  ;;  %1544 = vmatpush3.bf16.msra.mxu1 %v2103_v9  ;;  %v117_v20 = vld [vmem:[#allocation6 + $0x38] sm:$0xff]  ;;  %v2110_v21 = vpack.c.bf16 %v251_v18, %v250_v17  ;;  %v252_v23 = vld [vmem:[#allocation8 + $0x30] sm:$0xff]  ;;  %v118_v25 = vld [vmem:[#allocation6 + $0x40] sm:$0xff] }
  0x74   :  { %1515 = vmatprep.subr.bf16.mxu0 %v1514_v10  ;;  %1545 = vmatprep.subr.bf16.mxu1 %v1962_v0  ;;  %v1522_v22 = vpack.c.bf16 %v117_v20, %v116_v19  ;;  %v253_v24 = vld [vmem:[#allocation8 + $0x38] sm:$0xff]  ;;  %v119_v26 = vld [vmem:[#allocation6 + $0x48] sm:$0xff]  ;;  %v102_v27 = vld [vmem:[#allocation3] sm:$0xff]  ;;  %p1929_p9 = por %p1928_p8, %p1927_p7 }
  0x75   :  { %1183 = vmatprep.mubr.f32.mxu0 %v102_v27  ;;  %v2114_v28 = vpack.c.bf16 %v253_v24, %v252_v23  ;;  %v1526_v29 = vpack.c.bf16 %v119_v26, %v118_v25  ;;  %v254_v30 = vld [vmem:[#allocation8 + $0x40] sm:$0xff]  ;;  %v255_v31 = vld [vmem:[#allocation8 + $0x48] sm:$0xff]  ;;  %v120_v32 = vld [vmem:[#allocation6 + $0x50] sm:$0xff] }
  0x76   :  { %v121_v33 = vld [vmem:[#allocation6 + $0x58] sm:$0xff]  ;;  %v2118_v34 = vpack.c.bf16 %v255_v31, %v254_v30  ;;  %v256_v36 = vld [vmem:[#allocation8 + $0x50] sm:$0xff]  ;;  %v122_v38 = vld [vmem:[#allocation6 + $0x60] sm:$0xff]  ;;  %p1930_p10 = pnand %p1929_p9, %p1923_p6 }
  0x77   :  { %1517 = vmatpush3.bf16.msra.mxu0 %v1514_v10  ;;  %1547 = vmatpush3.bf16.msra.mxu1 %v2106_v15  ;;  %v1530_v35 = vpack.c.bf16 %v121_v33, %v120_v32  ;;  %v257_v37 = vld [vmem:[#allocation8 + $0x58] sm:$0xff]  ;;  %v123_v39 = vld [vmem:[#allocation6 + $0x68] sm:$0xff]  ;;  %v258_v42 = vld [vmem:[#allocation8 + $0x60] sm:$0xff] }
  0x78   :  { %1519 = vmatprep.subr.bf16.mxu0 %v1518_v16  ;;  %1548 = vmatprep.subr.bf16.mxu1 %v1962_v0  ;;  %v2122_v40 = vpack.c.bf16 %v257_v37, %v256_v36  ;;  %v1534_v41 = vpack.c.bf16 %v123_v39, %v122_v38  ;;  %v259_v43 = vld [vmem:[#allocation8 + $0x68] sm:$0xff]  ;;  %v124_v44 = vld [vmem:[#allocation6 + $0x70] sm:$0xff]  ;;  %v125_v45 = vld [vmem:[#allocation6 + $0x78] sm:$0xff] }
  0x79   :  { %v2126_v46 = vpack.c.bf16 %v259_v43, %v258_v42  ;;  %v1538_v47 = vpack.c.bf16 %v125_v45, %v124_v44  ;;  %v260_v48 = vld [vmem:[#allocation8 + $0x70] sm:$0xff]  ;;  %v261_v49 = vld [vmem:[#allocation8 + $0x78] sm:$0xff]  ;;  %v103_v51 = vld [vmem:[#allocation3 + $0x8] sm:$0xff] }
  0x7a   :  { %v2130_v50 = vpack.c.bf16 %v261_v49, %v260_v48  ;;  %v104_v52 = vld [vmem:[#allocation3 + $0x10] sm:$0xff]  ;;  %v105_v53 = vld [vmem:[#allocation3 + $0x18] sm:$0xff]  ;;  %v106_v54 = vld [vmem:[#allocation3 + $0x20] sm:$0xff] }
  0x7b   :  { %1521 = vmatpush3.bf16.msra.mxu0 %v1518_v16  ;;  %1550 = vmatpush3.bf16.msra.mxu1 %v2110_v21  ;;  %v107_v55 = vld [vmem:[#allocation3 + $0x28] sm:$0xff]  ;;  %v108_v56 = vld [vmem:[#allocation3 + $0x30] sm:$0xff]  ;;  %v109_v57 = vld [vmem:[#allocation3 + $0x38] sm:$0xff] }
  0x7c   :  { %1523 = vmatprep.subr.bf16.mxu0 %v1522_v22  ;;  %1551 = vmatprep.subr.bf16.mxu1 %v1962_v0  ;;  %v2173_v58 = vld [vmem:[#allocation9] ss:$0 sm:$0xff]  ;;  %v854_v36 = vld [vmem:[#allocation11 + $0x8] sm:$0xff]  ;;  %v855_v37 = vld [vmem:[#allocation11 + $0x10] sm:$0xff] }
  0x7d   :  { %v856_v39 = vld [vmem:[#allocation11 + $0x18] sm:$0xff]  ;;  %v858_v42 = vld [vmem:[#allocation11 + $0x28] sm:$0xff]  ;;  %v859_v44 = vld [vmem:[#allocation11 + $0x30] sm:$0xff] }
  0x7e   :  { %v860_v45 = vld [vmem:[#allocation11 + $0x38] sm:$0xff] }
  0x7f   :  { %1525 = vmatpush3.bf16.msra.mxu0 %v1522_v22  ;;  %1553 = vmatpush3.bf16.msra.mxu1 %v2114_v28 }
  0x80   :  { %1527 = vmatprep.subr.bf16.mxu0 %v1526_v29  ;;  %1554 = vmatprep.subr.bf16.mxu1 %v1962_v0 }
  0x83   :  { %1529 = vmatpush3.bf16.msra.mxu0 %v1526_v29  ;;  %1556 = vmatpush3.bf16.msra.mxu1 %v2118_v34 }
  0x84   :  { %1531 = vmatprep.subr.bf16.mxu0 %v1530_v35  ;;  %1557 = vmatprep.subr.bf16.mxu1 %v1962_v0 }
  0x87   :  { %1533 = vmatpush3.bf16.msra.mxu0 %v1530_v35  ;;  %1559 = vmatpush3.bf16.msra.mxu1 %v2122_v40  ;;  %v853_v35 = vld [vmem:[#allocation11] sm:$0xff] }
  0x88   :  { %1535 = vmatprep.subr.bf16.mxu0 %v1534_v41  ;;  %1560 = vmatprep.subr.bf16.mxu1 %v1962_v0  ;;  %v1735_v38 = vpack.c.bf16 %v854_v36, %v853_v35 }
  0x8b   :  { %1537 = vmatpush3.bf16.msra.mxu0 %v1534_v41  ;;  %1562 = vmatpush3.bf16.msra.mxu1 %v2126_v46  ;;  %v857_v41 = vld [vmem:[#allocation11 + $0x20] sm:$0xff] }
  0x8c   :  { %1539 = vmatprep.subr.bf16.mxu0 %v1538_v47  ;;  %1563 = vmatprep.subr.bf16.mxu1 %v1962_v0  ;;  %v1741_v43 = vpack.c.bf16 %v858_v42, %v857_v41 }
  0x8f   :  { %1541 = vmatpush3.bf16.msra.mxu0 %v1538_v47  ;;  %1565 = vmatpush3.bf16.msra.mxu1 %v2130_v50  ;;  %v862_v47 = vld [vmem:[#allocation11 + $0x48] sm:$0xff] }
  0x90   :  { %1566 = vmatprep.subr.bf16.mxu0 %v1962_v0  ;;  %1590 = vmatprep.subr.bf16.mxu1 %v1962_v0 }
  0x92   :  { %1184 = vmatmul.mubr.f32.vlgmr.msra.gmra.mrb[0].mxu0 %v103_v51  ;;  %1228 = vmatmul.mubr.f32.vlgmr.msra.gmra.mrb[0].mxu1 %v1964_v1 }
  0x93   :  { %1568 = vmatpush3.bf16.msra.mxu0 %v2103_v9  ;;  %1592 = vmatpush3.bf16.msra.mxu1 %v2103_v9 }
  0x94   :  { %1569 = vmatprep.subr.bf16.mxu0 %v1962_v0  ;;  %1593 = vmatprep.subr.bf16.mxu1 %v1962_v0 }
  0x95   :  { %1297 = vmatprep.mubr.msk.f32.mxu1 %vm1963_vm0, %v1964_v1  ;;  %1186 = vmatprep.mubr.f32.mxu0 %v104_v52 }
  0x96   :  { %1187 = vmatmul.mubr.f32.gmra.mrb[2].mxu0 %v105_v53 }
  0x97   :  { %1571 = vmatpush3.bf16.msra.mxu0 %v2106_v15  ;;  %1595 = vmatpush3.bf16.msra.mxu1 %v2106_v15 }
  0x98   :  { %1572 = vmatprep.subr.bf16.mxu0 %v1962_v0  ;;  %1596 = vmatprep.subr.bf16.mxu1 %v1962_v0 }
  0x99   :  { %1189 = vmatprep.mubr.f32.mxu0 %v106_v54  ;;  %v863_v54 = vld [vmem:[#allocation11 + $0x50] sm:$0xff] }
  0x9a   :  { %1190 = vmatmul.mubr.f32.gmra.mrb[4].mxu0 %v107_v55  ;;  %v864_v55 = vld [vmem:[#allocation11 + $0x58] sm:$0xff] }
  0x9b   :  { %1574 = vmatpush3.bf16.msra.mxu0 %v2110_v21  ;;  %1598 = vmatpush3.bf16.msra.mxu1 %v2110_v21 }
  0x9c   :  { %1575 = vmatprep.subr.bf16.mxu0 %v1962_v0  ;;  %1599 = vmatprep.subr.bf16.mxu1 %v1962_v0 }
  0x9d   :  { %1192 = vmatprep.mubr.f32.mxu0 %v108_v56  ;;  %v1750_v56 = vpack.c.bf16 %v864_v55, %v863_v54 }
  0x9e   :  { %1193 = vmatmul.mubr.f32.gmra.mrb[6].mxu0 %v109_v57  ;;  %v865_v57 = vld [vmem:[#allocation11 + $0x60] sm:$0xff] }
  0x9f   :  { %1577 = vmatpush3.bf16.msra.mxu0 %v2114_v28  ;;  %1601 = vmatpush3.bf16.msra.mxu1 %v2114_v28 }
  0xa0   :  { %1578 = vmatprep.subr.bf16.mxu0 %v1962_v0  ;;  %1602 = vmatprep.subr.bf16.mxu1 %v1962_v0 }
  0xa1   :  { %1262 = vmatprep.mubr.msk.f32.mxu0 %vm1963_vm0, %v1964_v1 }
  0xa3   :  { %1580 = vmatpush3.bf16.msra.mxu0 %v2118_v34  ;;  %1604 = vmatpush3.bf16.msra.mxu1 %v2118_v34 }
  0xa4   :  { %1581 = vmatprep.subr.bf16.mxu0 %v1962_v0  ;;  %1605 = vmatprep.subr.bf16.mxu1 %v1962_v0 }
  0xa7   :  { %1583 = vmatpush3.bf16.msra.mxu0 %v2122_v40  ;;  %1607 = vmatpush3.bf16.msra.mxu1 %v2122_v40 }
  0xa8   :  { %1584 = vmatprep.subr.bf16.mxu0 %v1962_v0  ;;  %1608 = vmatprep.subr.bf16.mxu1 %v1962_v0 }
  0xab   :  { %1586 = vmatpush3.bf16.msra.mxu0 %v2126_v46  ;;  %1610 = vmatpush3.bf16.msra.mxu1 %v2126_v46 }
  0xac   :  { %1587 = vmatprep.subr.bf16.mxu0 %v1962_v0  ;;  %1611 = vmatprep.subr.bf16.mxu1 %v1962_v0 }
  0xaf   :  { %1589 = vmatpush3.bf16.msra.mxu0 %v2130_v50  ;;  %1613 = vmatpush3.bf16.msra.mxu1 %v2130_v50 }
  0xb0   :  { %1614 = vmatprep.subr.bf16.mxu0 %v1962_v0  ;;  %1638 = vmatprep.subr.bf16.mxu1 %v1962_v0 }
 0x165   :  { %v1185_v59 = vpop.f32.mrb[0].mxu0  ;;  %v329_v60 = vpop.f32.mrb[0].mxu1 }
 0x166   :  { %v199_v61 = vpop.f32.mrb[1].mxu0  ;;  %v1229_v62 = vpop.f32.mrb[1].mxu1  ;;  %v205_v11 = vadd.f32 %v1185_v59, %v2173_v58  ;;  %v866_v59 = vld [vmem:[#allocation11 + $0x68] sm:$0xff] }
 0x167   :  { %v200_v63 = vadd.f32 %v2173_v58, %v199_v61  ;;  %v867_v61 = vld [vmem:[#allocation11 + $0x70] sm:$0xff]  ;;  %v868_v62 = vld [vmem:[#allocation11 + $0x78] sm:$0xff] }
 0x169   :  { %v333_v2 = vadd.f32 %v329_v60, %v200_v63  ;;  %v1188_v4 = vpop.f32.mrb[2].mxu0  ;;  %v1753_v60 = vpack.c.bf16 %v866_v59, %v865_v57  ;;  %v1756_v63 = vpack.c.bf16 %v868_v62, %v867_v61 }
 0x16a   :  { %v209_v5 = vpop.f32.mrb[3].mxu0  ;;  %v215_v23 = vadd.f32 %v1188_v4, %v2173_v58 }
 0x16b   :  { %1770 = vtanh.f32 %v333_v2  ;;  %v210_v17 = vadd.f32 %v2173_v58, %v209_v5 }
 0x16d   :  { %v2194_v6 = vpop.f32.mrb[4].mxu0 }
 0x16e   :  { %v2196_v7 = vpop.f32.mrb[5].mxu0 }
 0x16f   :  { %v220_v29 = vadd.f32 %v2173_v58, %v2196_v7  ;;  %v972_v7 = vld [vmem:[#allocation12] ss:$0 sm:$0xff] }
 0x171   :  { %v2198_v8 = vpop.f32.mrb[6].mxu0 }
 0x172   :  { %v2200_v10 = vpop.f32.mrb[7].mxu0  ;;  %v235_v2 = vadd.f32 %v2198_v8, %v2173_v58 }
 0x173   :  { %v230_v49 = vadd.f32 %v2173_v58, %v2200_v10 }
 0x175   :  { %v1771_v3 = vpop.eup %1770 }
 0x176   :  { %1263 = vmatmul.mubr.f32.vlgmr.msra.gmra.mrb[8].mxu0 %v1771_v3 }
 0x177   :  { %1616 = vmatpush3.bf16.msra.mxu0 %v2103_v9  ;;  %1332 = vmatprep.mubr.msk.f32.mxu0 %vm1963_vm0, %v1964_v1 }
 0x178   :  { %1617 = vmatprep.subr.bf16.mxu0 %v1962_v0 }
 0x17b   :  { %1619 = vmatpush3.bf16.msra.mxu0 %v2106_v15 }
 0x17c   :  { %1620 = vmatprep.subr.bf16.mxu0 %v1962_v0 }
 0x17f   :  { %1622 = vmatpush3.bf16.msra.mxu0 %v2110_v21 }
 0x180   :  { %1623 = vmatprep.subr.bf16.mxu0 %v1962_v0 }
 0x183   :  { %1625 = vmatpush3.bf16.msra.mxu0 %v2114_v28 }
 0x184   :  { %1626 = vmatprep.subr.bf16.mxu0 %v1962_v0 }
 0x187   :  { %1628 = vmatpush3.bf16.msra.mxu0 %v2118_v34 }
 0x188   :  { %1629 = vmatprep.subr.bf16.mxu0 %v1962_v0 }
 0x18b   :  { %1631 = vmatpush3.bf16.msra.mxu0 %v2122_v40 }
 0x18c   :  { %1632 = vmatprep.subr.bf16.mxu0 %v1962_v0 }
 0x18f   :  { %1634 = vmatpush3.bf16.msra.mxu0 %v2126_v46 }
 0x190   :  { %1635 = vmatprep.subr.bf16.mxu0 %v1962_v0 }
 0x193   :  { %1637 = vmatpush3.bf16.msra.mxu0 %v2130_v50 }
 0x194   :  { %1662 = vmatprep.subr.bf16.mxu0 %v1962_v0 }
 0x249   :  { %v403_v12 = vpop.f32.mrb[8].mxu0 }
 0x24a   :  { %v407_v13 = vadd.f32 %v403_v12, %v205_v11  ;;  %v1264_v14 = vpop.f32.mrb[9].mxu0 }
 0x24c   :  { %1772 = vtanh.f32 %v407_v13 }
 0x256   :  { %v1773_v16 = vpop.eup %1772 }
 0x257   :  { %1298 = vmatmul.mubr.f32.vlgmr.msra.gmra.mrb[2].mxu1 %v1773_v16 }
 0x258   :  { %1640 = vmatpush3.bf16.msra.mxu1 %v2103_v9  ;;  %1367 = vmatprep.mubr.msk.f32.mxu1 %vm1963_vm0, %v1964_v1 }
 0x259   :  { %1641 = vmatprep.subr.bf16.mxu1 %v1962_v0 }
 0x25c   :  { %1643 = vmatpush3.bf16.msra.mxu1 %v2106_v15 }
 0x25d   :  { %1644 = vmatprep.subr.bf16.mxu1 %v1962_v0 }
 0x260   :  { %1646 = vmatpush3.bf16.msra.mxu1 %v2110_v21 }
 0x261   :  { %1647 = vmatprep.subr.bf16.mxu1 %v1962_v0 }
 0x264   :  { %1649 = vmatpush3.bf16.msra.mxu1 %v2114_v28 }
 0x265   :  { %1650 = vmatprep.subr.bf16.mxu1 %v1962_v0 }
 0x268   :  { %1652 = vmatpush3.bf16.msra.mxu1 %v2118_v34 }
 0x269   :  { %1653 = vmatprep.subr.bf16.mxu1 %v1962_v0 }
 0x26c   :  { %1655 = vmatpush3.bf16.msra.mxu1 %v2122_v40 }
 0x26d   :  { %1656 = vmatprep.subr.bf16.mxu1 %v1962_v0 }
 0x270   :  { %1658 = vmatpush3.bf16.msra.mxu1 %v2126_v46 }
 0x271   :  { %1659 = vmatprep.subr.bf16.mxu1 %v1962_v0 }
 0x274   :  { %1661 = vmatpush3.bf16.msra.mxu1 %v2130_v50 }
 0x275   :  { %1686 = vmatprep.subr.bf16.mxu1 %v1962_v0 }
 0x32a   :  { %v477_v18 = vpop.f32.mrb[2].mxu1 }
 0x32b   :  { %v481_v19 = vadd.f32 %v477_v18, %v210_v17  ;;  %v1299_v20 = vpop.f32.mrb[3].mxu1 }
 0x32d   :  { %1774 = vtanh.f32 %v481_v19 }
 0x337   :  { %v1775_v22 = vpop.eup %1774 }
 0x338   :  { %1333 = vmatmul.mubr.f32.vlgmr.msra.gmra.mrb[10].mxu0 %v1775_v22 }
 0x339   :  { %1664 = vmatpush3.bf16.msra.mxu0 %v2103_v9  ;;  %1402 = vmatprep.mubr.msk.f32.mxu0 %vm1963_vm0, %v1964_v1 }
 0x33a   :  { %1665 = vmatprep.subr.bf16.mxu0 %v1962_v0 }
 0x33d   :  { %1667 = vmatpush3.bf16.msra.mxu0 %v2106_v15 }
 0x33e   :  { %1668 = vmatprep.subr.bf16.mxu0 %v1962_v0 }
 0x341   :  { %1670 = vmatpush3.bf16.msra.mxu0 %v2110_v21 }
 0x342   :  { %1671 = vmatprep.subr.bf16.mxu0 %v1962_v0 }
 0x345   :  { %1673 = vmatpush3.bf16.msra.mxu0 %v2114_v28 }
 0x346   :  { %1674 = vmatprep.subr.bf16.mxu0 %v1962_v0 }
 0x349   :  { %1676 = vmatpush3.bf16.msra.mxu0 %v2118_v34 }
 0x34a   :  { %1677 = vmatprep.subr.bf16.mxu0 %v1962_v0 }
 0x34d   :  { %1679 = vmatpush3.bf16.msra.mxu0 %v2122_v40 }
 0x34e   :  { %1680 = vmatprep.subr.bf16.mxu0 %v1962_v0 }
 0x351   :  { %1682 = vmatpush3.bf16.msra.mxu0 %v2126_v46 }
 0x352   :  { %1683 = vmatprep.subr.bf16.mxu0 %v1962_v0 }
 0x355   :  { %1685 = vmatpush3.bf16.msra.mxu0 %v2130_v50 }
 0x356   :  { %1710 = vmatprep.subr.bf16.mxu0 %v1962_v0 }
 0x40b   :  { %v551_v24 = vpop.f32.mrb[10].mxu0 }
 0x40c   :  { %v555_v25 = vadd.f32 %v551_v24, %v215_v23  ;;  %v1334_v26 = vpop.f32.mrb[11].mxu0 }
 0x40e   :  { %1776 = vtanh.f32 %v555_v25 }
 0x418   :  { %v1777_v27 = vpop.eup %1776 }
 0x419   :  { %1368 = vmatmul.mubr.f32.vlgmr.msra.gmra.mrb[4].mxu1 %v1777_v27 }
 0x41a   :  { %1688 = vmatpush3.bf16.msra.mxu1 %v2103_v9  ;;  %1437 = vmatprep.mubr.msk.f32.mxu1 %vm1963_vm0, %v1964_v1 }
 0x41b   :  { %1689 = vmatprep.subr.bf16.mxu1 %v1962_v0 }
 0x41e   :  { %1691 = vmatpush3.bf16.msra.mxu1 %v2106_v15 }
 0x41f   :  { %1692 = vmatprep.subr.bf16.mxu1 %v1962_v0 }
 0x422   :  { %1694 = vmatpush3.bf16.msra.mxu1 %v2110_v21 }
 0x423   :  { %1695 = vmatprep.subr.bf16.mxu1 %v1962_v0 }
 0x426   :  { %1697 = vmatpush3.bf16.msra.mxu1 %v2114_v28 }
 0x427   :  { %1698 = vmatprep.subr.bf16.mxu1 %v1962_v0 }
 0x42a   :  { %1700 = vmatpush3.bf16.msra.mxu1 %v2118_v34 }
 0x42b   :  { %1701 = vmatprep.subr.bf16.mxu1 %v1962_v0 }
 0x42e   :  { %1703 = vmatpush3.bf16.msra.mxu1 %v2122_v40 }
 0x42f   :  { %1704 = vmatprep.subr.bf16.mxu1 %v1962_v0 }
 0x432   :  { %1706 = vmatpush3.bf16.msra.mxu1 %v2126_v46 }
 0x433   :  { %1707 = vmatprep.subr.bf16.mxu1 %v1962_v0 }
 0x436   :  { %1709 = vmatpush3.bf16.msra.mxu1 %v2130_v50 }
 0x437   :  { %1734 = vmatprep.subr.bf16.mxu1 %v1962_v0 }
 0x4ec   :  { %v625_v30 = vpop.f32.mrb[4].mxu1 }
 0x4ed   :  { %v629_v31 = vadd.f32 %v625_v30, %v220_v29  ;;  %v1369_v32 = vpop.f32.mrb[5].mxu1 }
 0x4ef   :  { %1778 = vtanh.f32 %v629_v31 }
 0x4f9   :  { %v1779_v33 = vpop.eup %1778 }
 0x4fa   :  { %1403 = vmatmul.mubr.f32.vlgmr.msra.gmra.mrb[12].mxu0 %v1779_v33 }
 0x4fb   :  { %1712 = vmatpush3.bf16.msra.mxu0 %v2103_v9  ;;  %1472 = vmatprep.mubr.msk.f32.mxu0 %vm1963_vm0, %v1964_v1  ;;  %v225_v9 = vadd.f32 %v2194_v6, %v2173_v58 }
 0x4fc   :  { %1713 = vmatprep.subr.bf16.mxu0 %v1962_v0 }
 0x4ff   :  { %1715 = vmatpush3.bf16.msra.mxu0 %v2106_v15 }
 0x500   :  { %1716 = vmatprep.subr.bf16.mxu0 %v1962_v0 }
 0x503   :  { %1718 = vmatpush3.bf16.msra.mxu0 %v2110_v21 }
 0x504   :  { %1719 = vmatprep.subr.bf16.mxu0 %v1962_v0 }
 0x507   :  { %1721 = vmatpush3.bf16.msra.mxu0 %v2114_v28 }
 0x508   :  { %1722 = vmatprep.subr.bf16.mxu0 %v1962_v0 }
 0x50b   :  { %1724 = vmatpush3.bf16.msra.mxu0 %v2118_v34 }
 0x50c   :  { %1725 = vmatprep.subr.bf16.mxu0 %v1962_v0 }
 0x50f   :  { %1727 = vmatpush3.bf16.msra.mxu0 %v2122_v40  ;;  %v1738_v40 = vpack.c.bf16 %v856_v39, %v855_v37 }
 0x510   :  { %1728 = vmatprep.subr.bf16.mxu0 %v1962_v0 }
 0x513   :  { %1730 = vmatpush3.bf16.msra.mxu0 %v2126_v46  ;;  %v1744_v46 = vpack.c.bf16 %v860_v45, %v859_v44 }
 0x514   :  { %1731 = vmatprep.subr.bf16.mxu0 %v1962_v0 }
 0x517   :  { %1733 = vmatpush3.bf16.msra.mxu0 %v2130_v50 }
 0x5cd   :  { %v699_v15 = vpop.f32.mrb[12].mxu0 }
 0x5ce   :  { %v703_v21 = vadd.f32 %v699_v15, %v225_v9  ;;  %v1404_v28 = vpop.f32.mrb[13].mxu0 }
 0x5d0   :  { %1780 = vtanh.f32 %v703_v21 }
 0x5da   :  { %v1781_v34 = vpop.eup %1780 }
 0x5db   :  { %1438 = vmatmul.mubr.f32.vlgmr.msra.gmra.mrb[6].mxu1 %v1781_v34 }
 0x5dc   :  { %1507 = vmatprep.mubr.msk.f32.mxu1 %vm1963_vm0, %v1964_v1  ;;  %1736 = vmatpush3.bf16.msra.mxu1 %v1735_v38  ;;  %v861_v1 = vld [vmem:[#allocation11 + $0x40] sm:$0xff] }
 0x5dd   :  { %1737 = vmatprep.subr.bf16.mxu1 %v1962_v0  ;;  %v1747_v48 = vpack.c.bf16 %v862_v47, %v861_v1 }
 0x5e0   :  { %1739 = vmatpush3.bf16.msra.mxu1 %v1738_v40 }
 0x5e1   :  { %1740 = vmatprep.subr.bf16.mxu1 %v1962_v0 }
 0x5e4   :  { %1742 = vmatpush3.bf16.msra.mxu1 %v1741_v43 }
 0x5e5   :  { %1743 = vmatprep.subr.bf16.mxu1 %v1962_v0 }
 0x5e8   :  { %1745 = vmatpush3.bf16.msra.mxu1 %v1744_v46 }
 0x5e9   :  { %1746 = vmatprep.subr.bf16.mxu1 %v1962_v0 }
 0x5ec   :  { %1748 = vmatpush3.bf16.msra.mxu1 %v1747_v48 }
 0x5ed   :  { %1749 = vmatprep.subr.bf16.mxu1 %v1962_v0 }
 0x5f0   :  { %1751 = vmatpush3.bf16.msra.mxu1 %v1750_v56 }
 0x5f1   :  { %1752 = vmatprep.subr.bf16.mxu1 %v1962_v0 }
 0x5f4   :  { %1754 = vmatpush3.bf16.msra.mxu1 %v1753_v60 }
 0x5f5   :  { %1755 = vmatprep.subr.bf16.mxu1 %v1962_v0 }
 0x5f8   :  { %1757 = vmatpush3.bf16.msra.mxu1 %v1756_v63 }
 0x6ae   :  { %v773_v50 = vpop.f32.mrb[6].mxu1 }
 0x6af   :  { %v777_v51 = vadd.f32 %v773_v50, %v230_v49  ;;  %v1439_v52 = vpop.f32.mrb[7].mxu1 }
 0x6b1   :  { %1782 = vtanh.f32 %v777_v51 }
 0x6bb   :  { %v1783_v53 = vpop.eup %1782 }
 0x6bc   :  { %1473 = vmatmul.mubr.f32.vlgmr.msra.gmra.mrb[14].mxu0 %v1783_v53 }
 0x78f   :  { %v847_v3 = vpop.f32.mrb[14].mxu0 }
 0x790   :  { %v851_v4 = vadd.f32 %v847_v3, %v235_v2  ;;  %v1474_v5 = vpop.f32.mrb[15].mxu0 }
 0x792   :  { %1784 = vtanh.f32 %v851_v4 }
 0x79c   :  { %v1785_v6 = vpop.eup %1784 }
 0x79d   :  { %1508 = vmatmul.mubr.f32.vlgmr.msra.gmra.mrb[8].mxu1 %v1785_v6 }
 0x870   :  { %v942_v10 = vpop.f32.mrb[8].mxu1 }
 0x871   :  { %v943_v11 = vadd.f32 %v972_v7, %v942_v10  ;;  %v1509_v12 = vpop.f32.mrb[9].mxu1 }
 0x873   :  { %v973_v13 = vmul.f32 -1.442695, %v943_v11 }
 0x875   :  { %1786 = vpow2.f32 %v973_v13 }
 0x87f   :  { %v1787_v14 = vpop.eup %1786 }
 0x880   :  { %v949_v16 = vadd.f32 1.0, %v1787_v14 }
 0x882   :  { %1788 = vrcp.f32 %v949_v16 }
 0x88c   :  { %v1789_v0 = vpop.eup %1788 }
 0x88d   :  { %952 = vst [vmem:[#allocation14] sm:$0xff] %v1789_v0 }
 0x88e   :  { %1933 = shalt.err (!%p1930_p10)
}
 0x88f   :  { %s1934_s22 = scalar_lea.hbm %s2311_s6, 128 }
 0x890   :  { %p1935_p11 = scmp.ne.s32.totalorder %s2311_s6, %s1934_s22  ;;  %p1938_p12 = scmp.lt.u32.totalorder %s1934_s22, %s2311_s6 }
 0x892   :  { %p1940_p13 = pnand %p1938_p12, %p1935_p11 }
 0x894   :  { %1943 = shalt.err (!%p1940_p13)
}
 0x895   :  { %962 = dma.vmem_to_hbm [thread:$0]  %s960_s10, 128, %s2311_s6, [#allocation5]  }
 0x896   :  { %1952 = dma.done.wait [#allocation5], 128  }
 0x897   :  { %1953 = vsyncadd [#allocation5], 4294967168 }
 0x898   :  { %966 = vsyncpa [#allocation4], 1 }
 0x899   :  { %967 = vsyncpa [#allocation7], 1 }
 0x89a   :  { %968 = vsyncpa [#allocation10], 1 }
 0x89b   :  { %969 = vsyncpa [#allocation13], 1 }
 0x89c   :  { %970 = vsyncpa [#allocation5], 1 }

</bundles_post_ra>
